<compile_context>
chip_gen: v5e
topology: v5e:2x2
jax: 0.10.0
libtpu: 0.0.40
codegen_flags: <defaults>
</compile_context>

<pallas_src>
import functools

import jax
import jax.numpy as jnp
import numpy as np
from jax.experimental import pallas as pl
from jax.experimental.pallas import tpu as pltpu


_CHUNK_LANES = 1024        # flat-kernel output lanes per chunk (8 f32 vregs)
_MAX_STATIC_CHUNKS = 32    # fully unroll in-kernel chunk loops up to this count


def _pad_reps(kernel_size):
    front = kernel_size - 1 - (kernel_size - 1) // 2
    end = (kernel_size - 1) // 2
    return front, end


def _vmem_budgets():
    """(per-step block budget, vmem_limit_bytes, preferred min grid steps)."""
    kind = ""
    try:
        kind = jax.devices()[0].device_kind.lower()
    except Exception:
        pass
    if "v7" in kind or "7x" in kind:
        # 64 MiB VMEM per TensorCore, 2 TCs: leave headroom and keep >= 4 grid
        # steps so each core can still double-buffer its blocks.
        return 20 * 1024 * 1024, 48 * 1024 * 1024, 4
    if "v5" in kind or "v6" in kind:
        # 128 MiB VMEM, single TensorCore: just maximize the block.
        return 48 * 1024 * 1024, 96 * 1024 * 1024, 1
    return 20 * 1024 * 1024, 48 * 1024 * 1024, 2


def _pick_batch_tile(batch, per_row_bytes, budget, min_steps, *,
                     sublane_blocks, max_tile=None):
    """Largest batch tile (a divisor of `batch`) under the VMEM block budget.

    sublane_blocks=True: the batch tile is the second-minor dim of a 2D block,
    so it must be a multiple of 8 sublanes or the full batch axis.
    """
    hi = batch if max_tile is None else min(batch, max_tile)
    divs = [d for d in range(1, hi + 1) if batch % d == 0]
    if sublane_blocks:
        divs = [d for d in divs if d % 8 == 0 or d == batch]
        if not divs:
            divs = [batch]
    fit = [d for d in divs if d * per_row_bytes <= budget]
    if not fit:
        return min(divs)
    # Prefer keeping `min_steps` grid steps (feed both v7x TensorCores and keep
    # the pipeline double-buffered) as long as blocks stay >= ~1 MiB.
    stepped = [d for d in fit
               if batch // d >= min_steps and d * per_row_bytes >= (1 << 20)]
    return max(stepped) if stepped else max(fit)


def _window_sum(slab, out_len, taps, step):
    """result[..., p] = sum_{k<taps} slab[..., p + k*step] for p in [0, out_len).

    Log-time reassociation of the box filter: doubling partial sums
    S_{2m} = S_m + shift(S_m, m*step), combining one partial sum per set bit of
    `taps`, so only O(log2(taps) + popcount(taps)) lane-shifted adds hit the
    XLU instead of taps-1.  Requires slab.shape[-1] == out_len + (taps-1)*step.
    """
    cur = slab
    cur_len = slab.shape[-1]
    acc = None
    m, off, kk = 1, 0, taps
    while True:
        if kk & 1:
            piece = cur[..., off:off + out_len]
            acc = piece if acc is None else acc + piece
            off += m * step
        kk >>= 1
        if not kk:
            return acc
        new_len = cur_len - m * step
        cur = cur[..., :new_len] + cur[..., m * step:m * step + new_len]
        cur_len = new_len
        m *= 2


def _chunked(total, chunk, body, align):
    """Run body(start, size) over [0, total) in `chunk`-sized pieces.

    Short loops are fully unrolled so the LLO scheduler can interleave chunks;
    long loops use pl.loop with `align`-hinted dynamic starts.
    """
    n_full, rem = divmod(total, chunk)
    if n_full:
        if n_full <= _MAX_STATIC_CHUNKS:
            for i in range(n_full):
                body(i * chunk, chunk)
        else:
            @pl.loop(0, n_full)
            def _(i):
                body(pl.multiple_of(i * chunk, align), chunk)
    if rem:
        body(n_full * chunk, rem)


def _flat_moving_avg_kernel(x_ref, o_ref, pad_ref, *, kernel_size, seq_len,
                            channels, front_rep, chunk):
    """stride == 1, C < 128.

    x_ref:   (b_tile, L*C)          batch on sublanes, flat time*channel on lanes
    o_ref:   (b_tile, L*C)          output block
    pad_ref: (b_tile, (L+K-1)*C)    replicate-padded sequence (VMEM scratch)
    """
    K, L, C = kernel_size, seq_len, channels
    LC = L * C
    halo = (K - 1) * C
    end_rep = K - 1 - front_rep
    out_flat = o_ref.shape[-1]
    inv_k = jnp.float32(1.0 / K)

    # ---- replicate-padded sequence in VMEM (keeps chunk loads/stores aligned)
    # Front / end pads: one coalesced store each.
    if front_rep > 0:
        first = x_ref[:, 0:C]
        pad_ref[:, pl.ds(0, front_rep * C)] = jnp.concatenate(
            [first] * front_rep, axis=-1)
    if end_rep > 0:
        last = x_ref[:, LC - C:LC]
        pad_ref[:, pl.ds(front_rep * C + LC, end_rep * C)] = jnp.concatenate(
            [last] * end_rep, axis=-1)

    # Interior copy, chunked so no oversized value is ever live in vregs.
    def copy_piece(off, size):
        pad_ref[:, pl.ds(front_rep * C + off, size)] = x_ref[:, pl.ds(off, size)]

    _chunked(LC, chunk, copy_piece, 128)

    # ---- windowed mean, one output chunk at a time (acc stays in vregs) ----
    def avg_chunk(start, size):
        slab = pad_ref[:, pl.ds(start, size + halo)].astype(jnp.float32)
        acc = _window_sum(slab, size, K, C)
        o_ref[:, pl.ds(start, size)] = (acc * inv_k).astype(o_ref.dtype)

    _chunked(out_flat, chunk, avg_chunk, 128)


def _wide_moving_avg_kernel(x_ref, o_ref, pad_ref, *, kernel_size, seq_len,
                            front_rep, time_chunk):
    """stride == 1, C >= 128: time on sublanes, channels on lanes.

    x_ref:   (b_tile, L, C)
    o_ref:   (b_tile, l_out, C)
    pad_ref: (b_tile, L+K-1, C) replicate-padded along time (VMEM scratch)
    """
    K, L = kernel_size, seq_len
    bt, _, C = x_ref.shape
    l_out = o_ref.shape[1]
    end_rep = K - 1 - front_rep
    inv_k = jnp.float32(1.0 / K)

    # Replicate pads: one broadcast store each along the sublane (time) axis.
    if front_rep > 0:
        pad_ref[:, pl.ds(0, front_rep), :] = jnp.broadcast_to(
            x_ref[:, 0:1, :], (bt, front_rep, C))
    if end_rep > 0:
        pad_ref[:, pl.ds(front_rep + L, end_rep), :] = jnp.broadcast_to(
            x_ref[:, L - 1:L, :], (bt, end_rep, C))

    def copy_piece(t0, n):
        pad_ref[:, pl.ds(front_rep + t0, n), :] = x_ref[:, pl.ds(t0, n), :]

    _chunked(L, time_chunk, copy_piece, 8)

    def tap(t0, k, n):
        # Sublane-offset ref load: free addressing, no XLU lane rotate.
        return pad_ref[:, pl.ds(t0 + k, n), :].astype(jnp.float32)

    def avg_chunk(t0, n):
        # Two accumulation chains halve the serial add chain while keeping only
        # ~3 chunk-sized f32 values live (no vreg spills).
        acc0 = tap(t0, 0, n)
        acc1 = None
        if K > 1:
            acc1 = tap(t0, 1, n)
            for k in range(2, K, 2):
                acc0 = acc0 + tap(t0, k, n)
            for k in range(3, K, 2):
                acc1 = acc1 + tap(t0, k, n)
        acc = acc0 if acc1 is None else acc0 + acc1
        o_ref[:, pl.ds(t0, n), :] = (acc * inv_k).astype(o_ref.dtype)

    _chunked(l_out, time_chunk, avg_chunk, 8)


def _strided_moving_avg_kernel(x_ref, o_ref, pad_ref, *, kernel_size, stride,
                               seq_len, out_len, front_rep):
    """stride != 1 fallback (rare; Autoformer's series_decomp always uses 1).

    x_ref: (1, L, C), o_ref: (1, l_out, C), pad_ref: (L+K-1, C) VMEM scratch.
    """
    K, L = kernel_size, seq_len
    C = x_ref.shape[-1]
    end_rep = K - 1 - front_rep
    inv_k = jnp.float32(1.0 / K)

    x_val = x_ref[0]
    if front_rep > 0:
        pad_ref[pl.ds(0, front_rep), :] = jnp.broadcast_to(
            x_val[0:1, :], (front_rep, C))
    pad_ref[pl.ds(front_rep, L), :] = x_val
    if end_rep > 0:
        pad_ref[pl.ds(front_rep + L, end_rep), :] = jnp.broadcast_to(
            x_val[L - 1:L, :], (end_rep, C))

    @pl.loop(0, out_len)
    def _(t):
        win = pad_ref[pl.ds(t * stride, K), :].astype(jnp.float32)
        o_ref[:, pl.ds(t, 1), :] = (
            (jnp.sum(win, axis=0) * inv_k).astype(o_ref.dtype))[None, None, :]


def moving_avg(x, kernel_size, stride):
    """Equivalent of moving_avg(kernel_size, stride).forward(x), x: [B, L, C]."""
    B, L, C = x.shape
    K = int(kernel_size)
    stride = int(stride)
    front_rep, end_rep = _pad_reps(K)
    L_pad = L + K - 1
    l_out = (L_pad - K) // stride + 1
    itemsize = np.dtype(x.dtype).itemsize
    block_budget, vmem_limit, min_steps = _vmem_budgets()

    cparams = pltpu.CompilerParams(dimension_semantics=("parallel",),
                                   vmem_limit_bytes=vmem_limit)
    cost = pl.CostEstimate(flops=B * l_out * C * K,
                           transcendentals=0,
                           bytes_accessed=itemsize * B * C * (L + l_out))

    if stride == 1 and C < 128:
        LC = L * C
        out_flat = l_out * C                     # == LC for stride 1
        # double-buffered in + out blocks plus the pad scratch, per batch row
        per_row = itemsize * C * (2 * L + 2 * l_out + L_pad)
        b_tile = _pick_batch_tile(B, per_row, block_budget, min_steps,
                                  sublane_blocks=True)
        kern = functools.partial(
            _flat_moving_avg_kernel, kernel_size=K, seq_len=L, channels=C,
            front_rep=front_rep, chunk=_CHUNK_LANES)
        out = pl.pallas_call(
            kern,
            out_shape=jax.ShapeDtypeStruct((B, out_flat), x.dtype),
            grid=(B // b_tile,),
            in_specs=[pl.BlockSpec((b_tile, LC), lambda i: (i, 0))],
            out_specs=pl.BlockSpec((b_tile, out_flat), lambda i: (i, 0)),
            scratch_shapes=[pltpu.VMEM((b_tile, L_pad * C), x.dtype)],
            compiler_params=cparams,
            cost_estimate=cost,
        )(x.reshape(B, LC))
        return out.reshape(B, l_out, C)

    if stride == 1:
        # C >= 128: keep natural layout (time on sublanes, channels on lanes).
        c_pad = -(-C // 128) * 128
        per_row = itemsize * c_pad * (2 * L + 2 * l_out + L_pad)
        b_tile = _pick_batch_tile(B, per_row, block_budget, min_steps,
                                  sublane_blocks=False, max_tile=8)
        # Output-time chunk sized so ~3 chunk values stay comfortably in vregs.
        time_chunk = max(8, min(128, ((8192 // max(b_tile * C, 1)) // 8) * 8))
        kern = functools.partial(
            _wide_moving_avg_kernel, kernel_size=K, seq_len=L,
            front_rep=front_rep, time_chunk=time_chunk)
        return pl.pallas_call(
            kern,
            out_shape=jax.ShapeDtypeStruct((B, l_out, C), x.dtype),
            grid=(B // b_tile,),
            in_specs=[pl.BlockSpec((b_tile, L, C), lambda i: (i, 0, 0))],
            out_specs=pl.BlockSpec((b_tile, l_out, C), lambda i: (i, 0, 0)),
            scratch_shapes=[pltpu.VMEM((b_tile, L_pad, C), x.dtype)],
            compiler_params=cparams,
            cost_estimate=cost,
        )(x)

    # stride != 1: simple per-batch fallback.
    kern = functools.partial(
        _strided_moving_avg_kernel, kernel_size=K, stride=stride, seq_len=L,
        out_len=l_out, front_rep=front_rep)
    return pl.pallas_call(
        kern,
        out_shape=jax.ShapeDtypeStruct((B, l_out, C), x.dtype),
        grid=(B,),
        in_specs=[pl.BlockSpec((1, L, C), lambda b: (b, 0, 0))],
        out_specs=pl.BlockSpec((1, l_out, C), lambda b: (b, 0, 0)),
        scratch_shapes=[pltpu.VMEM((L_pad, C), x.dtype)],
        compiler_params=cparams,
        cost_estimate=cost,
    )(x)


def _reference(x, kernel_size, stride):
    # Pure-JAX reference mirroring the PyTorch module exactly
    # (front = K-1-floor((K-1)/2) reps, end = floor((K-1)/2) reps).
    front_rep, end_rep = _pad_reps(kernel_size)
    front = jnp.repeat(x[:, 0:1, :], front_rep, axis=1)
    end = jnp.repeat(x[:, -1:, :], end_rep, axis=1)
    xp = jnp.concatenate([front, x, end], axis=1)
    l_out = (xp.shape[1] - kernel_size) // stride + 1
    outs = [jnp.mean(xp[:, t * stride:t * stride + kernel_size, :], axis=1)
            for t in range(l_out)]
    return jnp.stack(outs, axis=1)


if __name__ == "__main__":
    root = jax.random.PRNGKey(0)
    k1, k2, k3 = jax.random.split(root, 3)

    # Case 1: small odd window, stride 1 (flat lane-packed kernel, C < 128).
    B, L, C = 2, 16, 8
    x = jax.random.normal(k1, (B, L, C), dtype=jnp.float32)
    out = jax.block_until_ready(moving_avg(x, 5, 1))
    assert out.shape == (B, L, C)   # stride=1 keeps the time length
    np.testing.assert_allclose(np.asarray(out),
                               np.asarray(_reference(x, 5, 1)),
                               rtol=1e-5, atol=1e-5)

    # Case 2: default Autoformer window (25), bf16, flat width not a multiple
    # of 128 (chunked pad copy, remainder chunk, log-time window sum).
    x2 = jax.random.normal(k2, (4, 200, 7), dtype=jnp.bfloat16)
    out2 = jax.block_until_ready(moving_avg(x2, 25, 1))
    ref2 = _reference(x2.astype(jnp.float32), 25, 1)
    np.testing.assert_allclose(np.asarray(out2).astype(np.float32),
                               np.asarray(ref2), rtol=2e-2, atol=2e-2)

    # Case 3: wide-channel path (C >= 128, time on sublanes) with a remainder
    # time chunk.
    x3 = jax.random.normal(k3, (2, 40, 256), dtype=jnp.float32)
    out3 = jax.block_until_ready(moving_avg(x3, 25, 1))
    np.testing.assert_allclose(np.asarray(out3),
                               np.asarray(_reference(x3, 25, 1)),
                               rtol=1e-5, atol=1e-5)

    # Case 4: stride > 1 fallback kernel.
    out4 = jax.block_until_ready(moving_avg(x, 4, 2))
    np.testing.assert_allclose(np.asarray(out4),
                               np.asarray(_reference(x, 4, 2)),
                               rtol=1e-5, atol=1e-5)

    print("KERNEL_OK")
</pallas_src>

<mosaic_0001>
module attributes {stable_mosaic.version = 11 : i64} {
  func.func @_flat_moving_avg_kernel(%arg0: i32, %arg1: memref<2x128xf32, #tpu.memory_space<vmem>>, %arg2: memref<2x128xf32, #tpu.memory_space<vmem>>, %arg3: memref<2x160xf32, #tpu.memory_space<vmem>>) attributes {dimension_semantics = [#tpu.dimension_semantics<parallel>], iteration_bounds = array<i64: 1>, scalar_prefetch = 0 : i64, scratch_operands = 1 : i64, tpu.core_type = #tpu.core_type<tc>, window_params = [{transform_indices = @transform_0, window_bounds = array<i64: 2, 128>}, {transform_indices = @transform_1, window_bounds = array<i64: 2, 128>}]} {
    %c0 = arith.constant 0 : index
    %c0_0 = arith.constant 0 : index
    %0 = vector.load %arg1[%c0, %c0_0] : memref<2x128xf32, #tpu.memory_space<vmem>>, vector<2x8xf32>
    %1 = tpu.concatenate %0, %0 in 1 : vector<2x8xf32>, vector<2x8xf32> -> vector<2x16xf32>
    %c0_1 = arith.constant 0 : index
    %c0_2 = arith.constant 0 : index
    %2 = vector.load %arg3[%c0_1, %c0_2] : memref<2x160xf32, #tpu.memory_space<vmem>>, vector<2x16xf32>
    tpu.vector_store %arg3[%c0_1, %c0_2], %1 {strides = array<i32>} : memref<2x160xf32, #tpu.memory_space<vmem>>, vector<2x16xf32>,
    %c0_3 = arith.constant 0 : index
    %c120 = arith.constant 120 : index
    %3 = vector.load %arg1[%c0_3, %c120] : memref<2x128xf32, #tpu.memory_space<vmem>>, vector<2x8xf32>
    %4 = tpu.concatenate %3, %3 in 1 : vector<2x8xf32>, vector<2x8xf32> -> vector<2x16xf32>
    %c0_4 = arith.constant 0 : index
    %c144 = arith.constant 144 : index
    %5 = vector.load %arg3[%c0_4, %c144] : memref<2x160xf32, #tpu.memory_space<vmem>>, vector<2x16xf32>
    tpu.vector_store %arg3[%c0_4, %c144], %4 {strides = array<i32>} : memref<2x160xf32, #tpu.memory_space<vmem>>, vector<2x16xf32>,
    %c0_5 = arith.constant 0 : index
    %c0_6 = arith.constant 0 : index
    %6 = vector.load %arg1[%c0_5, %c0_6] : memref<2x128xf32, #tpu.memory_space<vmem>>, vector<2x128xf32>
    %c0_7 = arith.constant 0 : index
    %c16 = arith.constant 16 : index
    %7 = vector.load %arg3[%c0_7, %c16] : memref<2x160xf32, #tpu.memory_space<vmem>>, vector<2x128xf32>
    tpu.vector_store %arg3[%c0_7, %c16], %6 {strides = array<i32>} : memref<2x160xf32, #tpu.memory_space<vmem>>, vector<2x128xf32>,
    %c0_8 = arith.constant 0 : index
    %c0_9 = arith.constant 0 : index
    %8 = vector.load %arg3[%c0_8, %c0_9] : memref<2x160xf32, #tpu.memory_space<vmem>>, vector<2x160xf32>
    %9 = vector.extract_strided_slice %8 {offsets = [0, 0], sizes = [2, 128], strides = [1, 1]} : vector<2x160xf32> to vector<2x128xf32>
    %10 = vector.extract_strided_slice %8 {offsets = [0, 0], sizes = [2, 152], strides = [1, 1]} : vector<2x160xf32> to vector<2x152xf32>
    %11 = vector.extract_strided_slice %8 {offsets = [0, 8], sizes = [2, 152], strides = [1, 1]} : vector<2x160xf32> to vector<2x152xf32>
    %12 = arith.addf %10, %11 : vector<2x152xf32>
    %13 = vector.extract_strided_slice %12 {offsets = [0, 0], sizes = [2, 136], strides = [1, 1]} : vector<2x152xf32> to vector<2x136xf32>
    %14 = vector.extract_strided_slice %12 {offsets = [0, 16], sizes = [2, 136], strides = [1, 1]} : vector<2x152xf32> to vector<2x136xf32>
    %15 = arith.addf %13, %14 : vector<2x136xf32>
    %16 = vector.extract_strided_slice %15 {offsets = [0, 8], sizes = [2, 128], strides = [1, 1]} : vector<2x136xf32> to vector<2x128xf32>
    %17 = arith.addf %9, %16 : vector<2x128xf32>
    %cst = arith.constant 2.000000e-01 : f32
    %18 = vector.broadcast %cst : f32 to vector<2x128xf32>
    %19 = arith.mulf %17, %18 : vector<2x128xf32>
    %c0_10 = arith.constant 0 : index
    %c0_11 = arith.constant 0 : index
    %20 = vector.load %arg2[%c0_10, %c0_11] : memref<2x128xf32, #tpu.memory_space<vmem>>, vector<2x128xf32>
    tpu.vector_store %arg2[%c0_10, %c0_11], %19 {strides = array<i32>} : memref<2x128xf32, #tpu.memory_space<vmem>>, vector<2x128xf32>,
    return
  }
  func.func @transform_0(%arg0: i32) -> (i32, i32) {
    %c0_i32 = arith.constant 0 : i32
    %c0_i32_0 = arith.constant 0 : i32
    return %arg0, %c0_i32 : i32, i32
  }
  func.func @transform_1(%arg0: i32) -> (i32, i32) {
    %c0_i32 = arith.constant 0 : i32
    %c0_i32_0 = arith.constant 0 : i32
    return %arg0, %c0_i32 : i32, i32
  }
}

</mosaic_0001>

<bundles_post_ra>
// kernel: tpu_custom_call.1
= control target key start
LH: loop header
LB: loop body
LE: loop exit
PB: predicated region body
PF: predicated region fallthrough
CT: control target
= control target key end

     0   :  { %6 = vsyncpa [#allocation4], 0  ;;  %s182_s0 = inlined_call_operand.hbm [shape: f32[2,128], index: 0, kind: input, shape index: {}]   ;;  %s183_s1 = inlined_call_operand.hbm [shape: f32[2,128], index: 1, kind: output, shape index: {}]  }
   0x1   :  { %7 = vsyncpa [#allocation5], 0  ;;  %s13_s8 = sshll.u32 %s182_s0, 4  ;;  %s160_s9 = smov [#allocation3]   ;;  %s14_s8 = int_to_ptr.hbm [resolvable:$true] %s13_s8 }
   0x2   :  { %s15_s10 = sshll.u32 %s160_s9, 4  ;;  %s16_s10 = int_to_ptr.vmem [resolvable:$true] %s15_s10 }
   0x3   :  { %18 = dma.hbm_to_vmem [thread:$0]  %s14_s8, 32, %s16_s10, [#allocation4]  }
   0x4   :  { %156 = dma.done.wait [#allocation4], 32  }
   0x5   :  { %157 = vsyncadd [#allocation4], 4294967264  ;;  %v32_v0 = vld [vmem:[#allocation3] sm:$0x3]  ;;  %s161_s11 = smov 8   ;;  %s162_s12 = smov 16  }
   0x6   :  { %v47_v1 = vld [vmem:[#allocation3] sm:$0x3]  ;;  %34 = vrot.lane.b32.xlu0 %v32_v0, %s161_s11  ;;  %vm28_vm0 = vcmask 64512   ;;  %vm30_vm1 = vcmask 123904   ;;  %vm55_vm2 = vcmask 1041536   ;;  %vm56_vm3 = vcmask 125954  }
   0x7   :  { %49 = vrot.lane.b32.xlu1 %v47_v1, %s162_s12  ;;  %v23_v2 = vld [vmem:[#allocation3] sm:$0x3]  ;;  %vm52_vm4 = vcmask 130048   ;;  %vm45_vm5 = vcmask 255104   ;;  %vm57_vm6 = vmor %vm56_vm3, %vm55_vm2  ;;  %s163_s0 = smov 120   ;;  %vm64_vm7 = vcmask 982016  }
   0x8   :  { %s164_s13 = smov 112   ;;  %vm72_vm8 = vcmask 916480   ;;  %s165_s14 = smov [#allocation6]  }
   0x9   :  { %s90_s15 = sshll.u32 %s165_s14, 4  ;;  %s92_s18 = sshll.u32 %s183_s1, 4  ;;  %s91_s15 = int_to_ptr.vmem [resolvable:$true] %s90_s15  ;;  %s93_s18 = int_to_ptr.hbm [resolvable:$true] %s92_s18 }
   0xe   :  { %37 = vrot.lane.b32.xlu0 %v32_v0, %s162_s12 }
   0xf   :  { %25 = vrot.lane.b32.xlu1 %v23_v2, %s161_s11 }
  0x78   :  { %v35_v3 = vpop.permute.xlu0 %34 }
  0x79   :  { %v50_v4 = vpop.permute.xlu1 %49 }
  0x7a   :  { %v51_v9 = vrot.slane %v50_v4, 6 }
  0x7c   :  { %v53_v11 = vsel %vm52_vm4, %v51_v9, %v50_v4 }
  0x80   :  { %v38_v5 = vpop.permute.xlu0 %37 }
  0x81   :  { %v26_v6 = vpop.permute.xlu1 %25  ;;  %v40_v7 = vsel %vm28_vm0, %v35_v3, %v38_v5 }
  0x82   :  { %v29_v8 = vsel %vm28_vm0, %v23_v2, %v26_v6  ;;  %42 = vrot.lane.b32.xlu2 %v40_v7, %s162_s12 }
  0x83   :  { %31 = vst.msk [vmem:[#allocation2] sm:$0x3] %vm30_vm1, %v29_v8 }
  0xdc   :  { %v43_v10 = vpop.permute.xlu2 %42 }
  0xdd   :  { %46 = vst.msk [vmem:[#allocation2 + $0x2] sm:$0x3] %vm45_vm5, %v43_v10 }
  0xde   :  { %58 = vst.msk [vmem:[#allocation2] sm:$0xf] %vm57_vm6, %v53_v11 }
  0xe5   :  { %v59_v12 = vld [vmem:[#allocation2] sm:$0xf] }
  0xe6   :  { %61 = vrot.lane.b32.xlu2 %v59_v12, %s163_s0 }
 0x140   :  { %v62_v13 = vpop.permute.xlu2 %61 }
 0x141   :  { %v63_v14 = vrot.slane %v62_v13, 2 }
 0x143   :  { %v65_v15 = vsel %vm64_vm7, %v62_v13, %v63_v14 }
 0x144   :  { %v67_v16 = vadd.f32 %v65_v15, %v59_v12 }
 0x146   :  { %69 = vrot.lane.b32.xlu0 %v67_v16, %s164_s13 }
 0x1b8   :  { %v70_v17 = vpop.permute.xlu0 %69 }
 0x1b9   :  { %v71_v18 = vrot.slane %v70_v17, 2 }
 0x1bb   :  { %v73_v19 = vsel %vm72_vm8, %v70_v17, %v71_v18 }
 0x1bc   :  { %v75_v20 = vadd.f32 %v73_v19, %v67_v16 }
 0x1be   :  { %77 = vrot.lane.b32.xlu1 %v75_v20, %s163_s0 }
 0x230   :  { %v78_v21 = vpop.permute.xlu1 %77 }
 0x231   :  { %v79_v22 = vrot.slane %v78_v21, 2 }
 0x233   :  { %v80_v23 = vsel %vm64_vm7, %v78_v21, %v79_v22 }
 0x234   :  { %v82_v24 = vadd.f32 %v80_v23, %v59_v12 }
 0x236   :  { %v83_v25 = vmul.f32 0.2, %v82_v24 }
 0x238   :  { %84 = vst [vmem:[#allocation6] sm:$0x3] %v83_v25 }
 0x239   :  { %95 = dma.vmem_to_hbm [thread:$0]  %s91_s15, 32, %s93_s18, [#allocation5]  }
 0x23a   :  { %158 = dma.done.wait [#allocation5], 32  }
 0x23b   :  { %159 = vsyncadd [#allocation5], 4294967264 }
 0x23c   :  { %100 = vsyncpa [#allocation4], 1 }
 0x23d   :  { %101 = vsyncpa [#allocation5], 1 }

</bundles_post_ra>
